<compile_context>
chip_gen: v7x
topology: tpu7x:2x2x1
jax: 0.10.0
libtpu: 0.0.40
codegen_flags: <defaults>
</compile_context>

<pallas_src>
import jax
import jax.numpy as jnp
from jax.experimental import pallas as pl
from jax.experimental.pallas import tpu as pltpu

# ---- small config (structurally mirrors EEGclassification defaults) --------
B = 2            # batch
CHANS = 8        # chans
TOUT = 8         # timestamp (temporal length AFTER the two avg-pools)
CLS = 3          # cls
F1 = 4           # size1
D = 4            # size2
F2 = F1 * D      # size1 * size2
K1 = 7           # feel1 (odd -> symmetric 'same' padding)
K2 = 3           # feel2 (odd)
P1 = 2           # fixed in module
P2 = 5           # fixed in module
T = TOUT * P1 * P2           # raw temporal length fed to the CNN (80)
T1 = T // P1                 # length after first avg-pool (40)
PAD1 = (K1 - 1) // 2
PAD2 = (K2 - 1) // 2
DFLAT = TOUT * F2            # Linear input dim (timestamp * size1 * size2) = 128

BF2 = B * F2                 # 32 rows carried through the kernel
BCH = B * CHANS              # 16
TP = T1 + 2 * PAD2           # 42 (pool1 output incl. folded zero border)


def _elu(x):
    return jnp.where(x > 0.0, x, jnp.exp(jnp.minimum(x, 0.0)) - 1.0)


# ---------------------------- Pallas kernel ---------------------------------
def eeg_fused_kernel(x_ref, wsp_ref, m1_ref, b1f_ref, gmask_ref, s2_ref, b2_ref,
                     pool1_ref, wsep_ref, wpt_ref, s3_ref, b3_ref, pool2_ref,
                     wk_ref, seg_ref, bsum_ref, blin_ref, out_ref):
    """Single invocation, batch folded into sublanes (rows = b*F2 + g)."""
    x = x_ref[...]                                                  # (B*CHANS, T)

    # Depthwise spatial conv applied first (commutes with the temporal conv):
    # one block-diagonal matmul over batch.
    y = jnp.dot(wsp_ref[...], x, preferred_element_type=jnp.float32)   # (BF2, T)

    # Temporal conv Conv2d(1,F1,(1,K1),'same') + BN1 scale as banded matmuls,
    # per-filter group selected with (BF2,1) row masks; BN1 bias folded in b1f.
    dw = jnp.dot(y * gmask_ref[:, 0:1], m1_ref[0],
                 preferred_element_type=jnp.float32)
    for f in range(1, F1):
        dw = dw + jnp.dot(y * gmask_ref[:, f:f + 1], m1_ref[f],
                          preferred_element_type=jnp.float32)           # (BF2, T)

    # folded BN1 bias + BN2 + ELU
    dw = _elu((dw + b1f_ref[...]) * s2_ref[...] + b2_ref[...])

    # AvgPool2d((1,P1)) with the separable conv's zero border folded in.
    h = jnp.dot(dw, pool1_ref[...], preferred_element_type=jnp.float32)  # (BF2, TP)

    # Separable depthwise temporal conv (K2 taps, per-row weights).
    sep = wsep_ref[:, 0:1] * h[:, 0:T1]
    for k in range(1, K2):
        sep = sep + wsep_ref[:, k:k + 1] * h[:, k:k + T1]                # (BF2, T1)

    # Pointwise conv Conv2d(F1*D, F2, 1) as one block-diag matmul + BN3 + ELU
    # + AvgPool2d((1,P2)).
    p = jnp.dot(wpt_ref[...], sep, preferred_element_type=jnp.float32)   # (BF2, T1)
    feat = jnp.dot(_elu(p * s3_ref[...] + b3_ref[...]), pool2_ref[...],
                   preferred_element_type=jnp.float32)                   # (BF2, TOUT)

    # Fused permute(0,2,1) + flatten(start_dim=1) + Linear head, expressed as
    # elementwise * pre-permuted weights + two tiny matmuls (no relayout):
    #   out[b,c] = sum_{g,t} feat[b*F2+g, t] * wlin[t*F2+g, c] + blin[c]
    feat_rep = jnp.concatenate([feat] * CLS, axis=1)                     # (BF2, CLS*TOUT)
    z = jnp.dot(feat_rep * wk_ref[...], seg_ref[...],
                preferred_element_type=jnp.float32)                      # (BF2, CLS)
    out_ref[...] = jnp.dot(bsum_ref[...], z,
                           preferred_element_type=jnp.float32) + blin_ref[...]


# ------------------------------- wrapper -------------------------------------
@jax.jit
def eeg_forward(x, mask, kp):
    # mask is unused for pooling=None / layer=0 (matches the PyTorch forward).
    del mask
    xs = x.reshape(BCH, T)                     # fold batch into sublanes (free)
    vm = pl.BlockSpec(memory_space=pltpu.MemorySpace.VMEM)
    return pl.pallas_call(
        eeg_fused_kernel,
        out_shape=jax.ShapeDtypeStruct((B, CLS), jnp.float32),
        in_specs=[vm] * 17,
        out_specs=vm,
    )(xs, kp["wsp"], kp["m1"], kp["b1f"], kp["gmask"], kp["s2r"], kp["b2r"],
      kp["pool1e"], kp["wsepr"], kp["wptbd"], kp["s3r"], kp["b3r"], kp["pool2"],
      kp["wk"], kp["seg"], kp["bsum"], kp["blin"])


# ------------------- param packing (raw -> kernel operands) ------------------
def pack_params(p):
    f32 = jnp.float32
    eyeB = jnp.eye(B, dtype=f32)

    # Banded 'same'-padding temporal-conv matrices with BN1 scale folded in:
    #   m1[f, i, t] = w1[f, i - t + PAD1] * s1[f]   (when the tap index is valid)
    ii = jnp.arange(T)[:, None]
    tt = jnp.arange(T)[None, :]
    kk = ii - tt + PAD1
    valid = (kk >= 0) & (kk < K1)
    kk_c = jnp.clip(kk, 0, K1 - 1)
    m1 = jnp.stack([jnp.where(valid, p["w1"][f][kk_c], 0.0) for f in range(F1)])
    m1 = (m1 * p["s1"][:, None, None]).astype(f32)                 # (F1, T, T)

    # Block-diagonal (over batch) spatial depthwise weight.
    wsp = jnp.kron(eyeB, p["wdw"]).astype(f32)                     # (BF2, BCH)

    # BN1 bias pushed through the spatial conv: b1[f(g)] * sum_c wdw[g, c]
    b1f = p["b1"][jnp.arange(F2) // D] * jnp.sum(p["wdw"], axis=1)  # (F2,)
    b1f = jnp.tile(b1f, B).reshape(BF2, 1).astype(f32)

    # Per-row filter-group selection mask.
    gmask = (jnp.arange(F2)[:, None] // D == jnp.arange(F1)[None, :]).astype(f32)
    gmask = jnp.tile(gmask, (B, 1))                                # (BF2, F1)

    # Folded BN scale/shift vectors, replicated over batch rows.
    s2r = jnp.tile(p["s2"], B).reshape(BF2, 1).astype(f32)
    b2r = jnp.tile(p["b2"], B).reshape(BF2, 1).astype(f32)
    s3r = jnp.tile(p["s3"], B).reshape(BF2, 1).astype(f32)
    b3r = jnp.tile(p["b3"], B).reshape(BF2, 1).astype(f32)

    # Avg-pool matrices; pool1 gets the separable conv's zero border folded in.
    pool1 = jnp.kron(jnp.eye(T1, dtype=f32), jnp.ones((P1, 1), f32)) / P1   # (T, T1)
    pool1e = jnp.concatenate(
        [jnp.zeros((T, PAD2), f32), pool1, jnp.zeros((T, PAD2), f32)], axis=1)  # (T, TP)
    pool2 = jnp.kron(jnp.eye(TOUT, dtype=f32), jnp.ones((P2, 1), f32)) / P2     # (T1, TOUT)

    wsepr = jnp.tile(p["wsep"], (B, 1)).astype(f32)                # (BF2, K2)
    wptbd = jnp.kron(eyeB, p["wpt"]).astype(f32)                   # (BF2, BF2)

    # Head weights, pre-permuted so permute+flatten+Linear become matmuls:
    #   wk[b*F2+g, c*TOUT+t] = wlin[t*F2+g, c]
    wlin3 = p["wlin"].reshape(TOUT, F2, CLS)
    wk1 = jnp.transpose(wlin3, (1, 2, 0)).reshape(F2, CLS * TOUT)
    wk = jnp.tile(wk1, (B, 1)).astype(f32)                         # (BF2, CLS*TOUT)
    seg = jnp.kron(jnp.eye(CLS, dtype=f32), jnp.ones((TOUT, 1), f32))   # (CLS*TOUT, CLS)
    bsum = jnp.kron(eyeB, jnp.ones((1, F2), f32))                  # (B, BF2)
    blin = p["blin"].reshape(1, CLS).astype(f32)

    return {"wsp": wsp, "m1": m1, "b1f": b1f, "gmask": gmask,
            "s2r": s2r, "b2r": b2r, "pool1e": pool1e, "wsepr": wsepr,
            "wptbd": wptbd, "s3r": s3r, "b3r": b3r, "pool2": pool2,
            "wk": wk, "seg": seg, "bsum": bsum, "blin": blin}


# ----------------------- pure-JAX reference (module math) --------------------
def reference_forward(x, mask, p):
    del mask
    f32 = jnp.float32
    pool1 = jnp.kron(jnp.eye(T1, dtype=f32), jnp.ones((P1, 1), f32)) / P1
    pool2 = jnp.kron(jnp.eye(TOUT, dtype=f32), jnp.ones((P2, 1), f32)) / P2
    xp = jnp.pad(x, ((0, 0), (0, 0), (PAD1, PAD1)))
    feats = []
    for b in range(x.shape[0]):
        xv = xp[b]
        acc_pw = jnp.zeros((F2, T1), f32)
        for f in range(F1):
            tc = sum(p["w1"][f, k] * xv[:, k:k + T] for k in range(K1))
            tc = tc * p["s1"][f] + p["b1"][f]
            dw = p["wdw"][f * D:(f + 1) * D] @ tc
            dw = _elu(dw * p["s2"][f * D:(f + 1) * D, None]
                      + p["b2"][f * D:(f + 1) * D, None])
            h = dw @ pool1
            hp = jnp.pad(h, ((0, 0), (PAD2, PAD2)))
            sep = sum(p["wsep"][f * D:(f + 1) * D, k:k + 1] * hp[:, k:k + T1]
                      for k in range(K2))
            acc_pw = acc_pw + p["wpt"][:, f * D:(f + 1) * D] @ sep
        y = _elu(acc_pw * p["s3"][:, None] + p["b3"][:, None]) @ pool2
        feats.append(y)
    hidden = jnp.transpose(jnp.stack(feats), (0, 2, 1)).reshape(x.shape[0], -1)
    return hidden @ p["wlin"] + p["blin"][None, :]


# ------------------------------ param init -----------------------------------
def init_params(key):
    ks = jax.random.split(key, 18)
    eps = 1e-5

    def folded_bn(kg, kb, km, kv, n):
        gamma = 1.0 + 0.1 * jax.random.normal(kg, (n,), jnp.float32)
        beta = 0.1 * jax.random.normal(kb, (n,), jnp.float32)
        mean = 0.1 * jax.random.normal(km, (n,), jnp.float32)
        var = jax.random.uniform(kv, (n,), jnp.float32, 0.5, 1.5)
        scale = gamma / jnp.sqrt(var + eps)
        shift = beta - mean * scale
        return scale, shift

    s1, b1 = folded_bn(ks[0], ks[1], ks[2], ks[3], F1)
    s2, b2 = folded_bn(ks[4], ks[5], ks[6], ks[7], F1 * D)
    s3, b3 = folded_bn(ks[8], ks[9], ks[10], ks[11], F2)

    return {
        "w1": 0.1 * jax.random.normal(ks[12], (F1, K1), jnp.float32),
        "s1": s1, "b1": b1,
        "wdw": 0.2 * jax.random.normal(ks[13], (F1 * D, CHANS), jnp.float32),
        "s2": s2, "b2": b2,
        "wsep": 0.2 * jax.random.normal(ks[14], (F1 * D, K2), jnp.float32),
        "wpt": 0.2 * jax.random.normal(ks[15], (F2, F1 * D), jnp.float32),
        "s3": s3, "b3": b3,
        "wlin": 0.05 * jax.random.normal(ks[16], (DFLAT, CLS), jnp.float32),
        "blin": 0.05 * jax.random.normal(ks[17], (CLS,), jnp.float32),
    }


if __name__ == "__main__":
    key = jax.random.PRNGKey(0)
    kx, kparam = jax.random.split(key, 2)
    x = jax.random.normal(kx, (B, CHANS, T), jnp.float32)
    mask = jnp.ones((B, TOUT), jnp.float32)

    raw = init_params(kparam)
    packed = pack_params(raw)

    out = jax.block_until_ready(eeg_forward(x, mask, packed))
    ref = reference_forward(x, mask, raw)

    assert out.shape == (B, CLS), out.shape
    assert bool(jnp.all(jnp.isfinite(out)))
    assert jnp.allclose(out, ref, atol=1e-3, rtol=1e-3), (out, ref)
    print("KERNEL_OK")
</pallas_src>

<mosaic_0001>
module attributes {stable_mosaic.version = 11 : i64} {
  func.func @eeg_fused_kernel(%arg0: memref<16x80xf32, #tpu.memory_space<vmem>>, %arg1: memref<32x16xf32, #tpu.memory_space<vmem>>, %arg2: memref<4x80x80xf32, #tpu.memory_space<vmem>>, %arg3: memref<32x1xf32, #tpu.memory_space<vmem>>, %arg4: memref<32x4xf32, #tpu.memory_space<vmem>>, %arg5: memref<32x1xf32, #tpu.memory_space<vmem>>, %arg6: memref<32x1xf32, #tpu.memory_space<vmem>>, %arg7: memref<80x42xf32, #tpu.memory_space<vmem>>, %arg8: memref<32x3xf32, #tpu.memory_space<vmem>>, %arg9: memref<32x32xf32, #tpu.memory_space<vmem>>, %arg10: memref<32x1xf32, #tpu.memory_space<vmem>>, %arg11: memref<32x1xf32, #tpu.memory_space<vmem>>, %arg12: memref<40x8xf32, #tpu.memory_space<vmem>>, %arg13: memref<32x24xf32, #tpu.memory_space<vmem>>, %arg14: memref<24x3xf32, #tpu.memory_space<vmem>>, %arg15: memref<2x32xf32, #tpu.memory_space<vmem>>, %arg16: memref<1x3xf32, #tpu.memory_space<vmem>>, %arg17: memref<2x3xf32, #tpu.memory_space<vmem>>) attributes {dimension_semantics = [], scalar_prefetch = 0 : i64, scratch_operands = 0 : i64, tpu.core_type = #tpu.core_type<tc>} {
    %c0 = arith.constant 0 : index
    %c0_0 = arith.constant 0 : index
    %0 = vector.load %arg0[%c0, %c0_0] : memref<16x80xf32, #tpu.memory_space<vmem>>, vector<16x80xf32>
    %c0_1 = arith.constant 0 : index
    %c0_2 = arith.constant 0 : index
    %1 = vector.load %arg1[%c0_1, %c0_2] : memref<32x16xf32, #tpu.memory_space<vmem>>, vector<32x16xf32>
    %cst = arith.constant dense<0.000000e+00> : vector<32x80xf32>
    %2 = tpu.matmul %1, %0, %cst {dimension_numbers = #tpu.dot_dimension_numbers<[1], [0], [0], [1], [0, 0, 1, 1], [], []>} : vector<32x16xf32>, vector<16x80xf32>, vector<32x80xf32> -> vector<32x80xf32>
    %c0_3 = arith.constant 0 : index
    %c0_4 = arith.constant 0 : index
    %3 = vector.load %arg4[%c0_3, %c0_4] : memref<32x4xf32, #tpu.memory_space<vmem>>, vector<32x1xf32>
    %4 = vector.broadcast %3 : vector<32x1xf32> to vector<32x80xf32>
    %5 = arith.mulf %2, %4 : vector<32x80xf32>
    %c0_5 = arith.constant 0 : index
    %c0_6 = arith.constant 0 : index
    %c0_7 = arith.constant 0 : index
    %6 = vector.load %arg2[%c0_5, %c0_6, %c0_7] : memref<4x80x80xf32, #tpu.memory_space<vmem>>, vector<1x80x80xf32>
    %7 = vector.shape_cast %6 : vector<1x80x80xf32> to vector<80x80xf32>
    %cst_8 = arith.constant dense<0.000000e+00> : vector<32x80xf32>
    %8 = tpu.matmul %5, %7, %cst_8 {dimension_numbers = #tpu.dot_dimension_numbers<[1], [0], [0], [1], [0, 0, 1, 1], [], []>} : vector<32x80xf32>, vector<80x80xf32>, vector<32x80xf32> -> vector<32x80xf32>
    %c0_9 = arith.constant 0 : index
    %c1 = arith.constant 1 : index
    %9 = vector.load %arg4[%c0_9, %c1] : memref<32x4xf32, #tpu.memory_space<vmem>>, vector<32x1xf32>
    %10 = vector.broadcast %9 : vector<32x1xf32> to vector<32x80xf32>
    %11 = arith.mulf %2, %10 : vector<32x80xf32>
    %c1_10 = arith.constant 1 : index
    %c0_11 = arith.constant 0 : index
    %c0_12 = arith.constant 0 : index
    %12 = vector.load %arg2[%c1_10, %c0_11, %c0_12] : memref<4x80x80xf32, #tpu.memory_space<vmem>>, vector<1x80x80xf32>
    %13 = vector.shape_cast %12 : vector<1x80x80xf32> to vector<80x80xf32>
    %cst_13 = arith.constant dense<0.000000e+00> : vector<32x80xf32>
    %14 = tpu.matmul %11, %13, %cst_13 {dimension_numbers = #tpu.dot_dimension_numbers<[1], [0], [0], [1], [0, 0, 1, 1], [], []>} : vector<32x80xf32>, vector<80x80xf32>, vector<32x80xf32> -> vector<32x80xf32>
    %15 = arith.addf %8, %14 : vector<32x80xf32>
    %c0_14 = arith.constant 0 : index
    %c2 = arith.constant 2 : index
    %16 = vector.load %arg4[%c0_14, %c2] : memref<32x4xf32, #tpu.memory_space<vmem>>, vector<32x1xf32>
    %17 = vector.broadcast %16 : vector<32x1xf32> to vector<32x80xf32>
    %18 = arith.mulf %2, %17 : vector<32x80xf32>
    %c2_15 = arith.constant 2 : index
    %c0_16 = arith.constant 0 : index
    %c0_17 = arith.constant 0 : index
    %19 = vector.load %arg2[%c2_15, %c0_16, %c0_17] : memref<4x80x80xf32, #tpu.memory_space<vmem>>, vector<1x80x80xf32>
    %20 = vector.shape_cast %19 : vector<1x80x80xf32> to vector<80x80xf32>
    %cst_18 = arith.constant dense<0.000000e+00> : vector<32x80xf32>
    %21 = tpu.matmul %18, %20, %cst_18 {dimension_numbers = #tpu.dot_dimension_numbers<[1], [0], [0], [1], [0, 0, 1, 1], [], []>} : vector<32x80xf32>, vector<80x80xf32>, vector<32x80xf32> -> vector<32x80xf32>
    %22 = arith.addf %15, %21 : vector<32x80xf32>
    %c0_19 = arith.constant 0 : index
    %c3 = arith.constant 3 : index
    %23 = vector.load %arg4[%c0_19, %c3] : memref<32x4xf32, #tpu.memory_space<vmem>>, vector<32x1xf32>
    %24 = vector.broadcast %23 : vector<32x1xf32> to vector<32x80xf32>
    %25 = arith.mulf %2, %24 : vector<32x80xf32>
    %c3_20 = arith.constant 3 : index
    %c0_21 = arith.constant 0 : index
    %c0_22 = arith.constant 0 : index
    %26 = vector.load %arg2[%c3_20, %c0_21, %c0_22] : memref<4x80x80xf32, #tpu.memory_space<vmem>>, vector<1x80x80xf32>
    %27 = vector.shape_cast %26 : vector<1x80x80xf32> to vector<80x80xf32>
    %cst_23 = arith.constant dense<0.000000e+00> : vector<32x80xf32>
    %28 = tpu.matmul %25, %27, %cst_23 {dimension_numbers = #tpu.dot_dimension_numbers<[1], [0], [0], [1], [0, 0, 1, 1], [], []>} : vector<32x80xf32>, vector<80x80xf32>, vector<32x80xf32> -> vector<32x80xf32>
    %29 = arith.addf %22, %28 : vector<32x80xf32>
    %c0_24 = arith.constant 0 : index
    %c0_25 = arith.constant 0 : index
    %30 = vector.load %arg3[%c0_24, %c0_25] : memref<32x1xf32, #tpu.memory_space<vmem>>, vector<32x1xf32>
    %31 = vector.broadcast %30 : vector<32x1xf32> to vector<32x80xf32>
    %32 = arith.addf %29, %31 : vector<32x80xf32>
    %c0_26 = arith.constant 0 : index
    %c0_27 = arith.constant 0 : index
    %33 = vector.load %arg5[%c0_26, %c0_27] : memref<32x1xf32, #tpu.memory_space<vmem>>, vector<32x1xf32>
    %34 = vector.broadcast %33 : vector<32x1xf32> to vector<32x80xf32>
    %35 = arith.mulf %32, %34 : vector<32x80xf32>
    %c0_28 = arith.constant 0 : index
    %c0_29 = arith.constant 0 : index
    %36 = vector.load %arg6[%c0_28, %c0_29] : memref<32x1xf32, #tpu.memory_space<vmem>>, vector<32x1xf32>
    %37 = vector.broadcast %36 : vector<32x1xf32> to vector<32x80xf32>
    %38 = arith.addf %35, %37 : vector<32x80xf32>
    %cst_30 = arith.constant 0.000000e+00 : f32
    %39 = vector.broadcast %cst_30 : f32 to vector<32x80xf32>
    %40 = arith.cmpf ogt, %38, %39 : vector<32x80xf32>
    %cst_31 = arith.constant 0.000000e+00 : f32
    %41 = vector.broadcast %cst_31 : f32 to vector<32x80xf32>
    %42 = arith.minimumf %38, %41 : vector<32x80xf32>
    %43 = math.exp %42 : vector<32x80xf32>
    %cst_32 = arith.constant 1.000000e+00 : f32
    %44 = vector.broadcast %cst_32 : f32 to vector<32x80xf32>
    %45 = arith.subf %43, %44 : vector<32x80xf32>
    %46 = arith.select %40, %38, %45 : vector<32x80xi1>, vector<32x80xf32>
    %c0_33 = arith.constant 0 : index
    %c0_34 = arith.constant 0 : index
    %47 = vector.load %arg7[%c0_33, %c0_34] : memref<80x42xf32, #tpu.memory_space<vmem>>, vector<80x42xf32>
    %cst_35 = arith.constant dense<0.000000e+00> : vector<32x42xf32>
    %48 = tpu.matmul %46, %47, %cst_35 {dimension_numbers = #tpu.dot_dimension_numbers<[1], [0], [0], [1], [0, 0, 1, 1], [], []>} : vector<32x80xf32>, vector<80x42xf32>, vector<32x42xf32> -> vector<32x42xf32>
    %c0_36 = arith.constant 0 : index
    %c0_37 = arith.constant 0 : index
    %49 = vector.load %arg8[%c0_36, %c0_37] : memref<32x3xf32, #tpu.memory_space<vmem>>, vector<32x1xf32>
    %50 = vector.extract_strided_slice %48 {offsets = [0, 0], sizes = [32, 40], strides = [1, 1]} : vector<32x42xf32> to vector<32x40xf32>
    %51 = vector.broadcast %49 : vector<32x1xf32> to vector<32x40xf32>
    %52 = arith.mulf %51, %50 : vector<32x40xf32>
    %c0_38 = arith.constant 0 : index
    %c1_39 = arith.constant 1 : index
    %53 = vector.load %arg8[%c0_38, %c1_39] : memref<32x3xf32, #tpu.memory_space<vmem>>, vector<32x1xf32>
    %54 = vector.extract_strided_slice %48 {offsets = [0, 1], sizes = [32, 40], strides = [1, 1]} : vector<32x42xf32> to vector<32x40xf32>
    %55 = vector.broadcast %53 : vector<32x1xf32> to vector<32x40xf32>
    %56 = arith.mulf %55, %54 : vector<32x40xf32>
    %57 = arith.addf %52, %56 : vector<32x40xf32>
    %c0_40 = arith.constant 0 : index
    %c2_41 = arith.constant 2 : index
    %58 = vector.load %arg8[%c0_40, %c2_41] : memref<32x3xf32, #tpu.memory_space<vmem>>, vector<32x1xf32>
    %59 = vector.extract_strided_slice %48 {offsets = [0, 2], sizes = [32, 40], strides = [1, 1]} : vector<32x42xf32> to vector<32x40xf32>
    %60 = vector.broadcast %58 : vector<32x1xf32> to vector<32x40xf32>
    %61 = arith.mulf %60, %59 : vector<32x40xf32>
    %62 = arith.addf %57, %61 : vector<32x40xf32>
    %c0_42 = arith.constant 0 : index
    %c0_43 = arith.constant 0 : index
    %63 = vector.load %arg9[%c0_42, %c0_43] : memref<32x32xf32, #tpu.memory_space<vmem>>, vector<32x32xf32>
    %cst_44 = arith.constant dense<0.000000e+00> : vector<32x40xf32>
    %64 = tpu.matmul %63, %62, %cst_44 {dimension_numbers = #tpu.dot_dimension_numbers<[1], [0], [0], [1], [0, 0, 1, 1], [], []>} : vector<32x32xf32>, vector<32x40xf32>, vector<32x40xf32> -> vector<32x40xf32>
    %c0_45 = arith.constant 0 : index
    %c0_46 = arith.constant 0 : index
    %65 = vector.load %arg10[%c0_45, %c0_46] : memref<32x1xf32, #tpu.memory_space<vmem>>, vector<32x1xf32>
    %66 = vector.broadcast %65 : vector<32x1xf32> to vector<32x40xf32>
    %67 = arith.mulf %64, %66 : vector<32x40xf32>
    %c0_47 = arith.constant 0 : index
    %c0_48 = arith.constant 0 : index
    %68 = vector.load %arg11[%c0_47, %c0_48] : memref<32x1xf32, #tpu.memory_space<vmem>>, vector<32x1xf32>
    %69 = vector.broadcast %68 : vector<32x1xf32> to vector<32x40xf32>
    %70 = arith.addf %67, %69 : vector<32x40xf32>
    %cst_49 = arith.constant 0.000000e+00 : f32
    %71 = vector.broadcast %cst_49 : f32 to vector<32x40xf32>
    %72 = arith.cmpf ogt, %70, %71 : vector<32x40xf32>
    %cst_50 = arith.constant 0.000000e+00 : f32
    %73 = vector.broadcast %cst_50 : f32 to vector<32x40xf32>
    %74 = arith.minimumf %70, %73 : vector<32x40xf32>
    %75 = math.exp %74 : vector<32x40xf32>
    %cst_51 = arith.constant 1.000000e+00 : f32
    %76 = vector.broadcast %cst_51 : f32 to vector<32x40xf32>
    %77 = arith.subf %75, %76 : vector<32x40xf32>
    %78 = arith.select %72, %70, %77 : vector<32x40xi1>, vector<32x40xf32>
    %c0_52 = arith.constant 0 : index
    %c0_53 = arith.constant 0 : index
    %79 = vector.load %arg12[%c0_52, %c0_53] : memref<40x8xf32, #tpu.memory_space<vmem>>, vector<40x8xf32>
    %cst_54 = arith.constant dense<0.000000e+00> : vector<32x8xf32>
    %80 = tpu.matmul %78, %79, %cst_54 {dimension_numbers = #tpu.dot_dimension_numbers<[1], [0], [0], [1], [0, 0, 1, 1], [], []>} : vector<32x40xf32>, vector<40x8xf32>, vector<32x8xf32> -> vector<32x8xf32>
    %81 = tpu.concatenate %80, %80, %80 in 1 : vector<32x8xf32>, vector<32x8xf32>, vector<32x8xf32> -> vector<32x24xf32>
    %c0_55 = arith.constant 0 : index
    %c0_56 = arith.constant 0 : index
    %82 = vector.load %arg13[%c0_55, %c0_56] : memref<32x24xf32, #tpu.memory_space<vmem>>, vector<32x24xf32>
    %83 = arith.mulf %81, %82 : vector<32x24xf32>
    %c0_57 = arith.constant 0 : index
    %c0_58 = arith.constant 0 : index
    %84 = vector.load %arg14[%c0_57, %c0_58] : memref<24x3xf32, #tpu.memory_space<vmem>>, vector<24x3xf32>
    %cst_59 = arith.constant dense<0.000000e+00> : vector<32x3xf32>
    %85 = tpu.matmul %83, %84, %cst_59 {dimension_numbers = #tpu.dot_dimension_numbers<[1], [0], [0], [1], [0, 0, 1, 1], [], []>} : vector<32x24xf32>, vector<24x3xf32>, vector<32x3xf32> -> vector<32x3xf32>
    %c0_60 = arith.constant 0 : index
    %c0_61 = arith.constant 0 : index
    %86 = vector.load %arg15[%c0_60, %c0_61] : memref<2x32xf32, #tpu.memory_space<vmem>>, vector<2x32xf32>
    %cst_62 = arith.constant dense<0.000000e+00> : vector<2x3xf32>
    %87 = tpu.matmul %86, %85, %cst_62 {dimension_numbers = #tpu.dot_dimension_numbers<[1], [0], [0], [1], [0, 0, 1, 1], [], []>} : vector<2x32xf32>, vector<32x3xf32>, vector<2x3xf32> -> vector<2x3xf32>
    %c0_63 = arith.constant 0 : index
    %c0_64 = arith.constant 0 : index
    %88 = vector.load %arg16[%c0_63, %c0_64] : memref<1x3xf32, #tpu.memory_space<vmem>>, vector<1x3xf32>
    %89 = vector.broadcast %88 : vector<1x3xf32> to vector<2x3xf32>
    %90 = arith.addf %87, %89 : vector<2x3xf32>
    %c0_65 = arith.constant 0 : index
    %c0_66 = arith.constant 0 : index
    %91 = vector.load %arg17[%c0_65, %c0_66] : memref<2x3xf32, #tpu.memory_space<vmem>>, vector<2x3xf32>
    tpu.vector_store %arg17[%c0_65, %c0_66], %90 {strides = array<i32>} : memref<2x3xf32, #tpu.memory_space<vmem>>, vector<2x3xf32>,
    return
  }
}

</mosaic_0001>

<bundles_post_ra>
// kernel: eeg_forward.1
= control target key start
LH: loop header
LB: loop body
LE: loop exit
PB: predicated region body
PF: predicated region fallthrough
CT: control target
= control target key end

     0   :  { %s2662_s0 = inlined_call_operand.vmem [shape: f32[16,80], index: 0, kind: input, shape index: {}]   ;;  %s2663_s1 = inlined_call_operand.vmem [shape: f32[32,16], index: 1, kind: input, shape index: {}]   ;;  %s2664_s2 = inlined_call_operand.vmem [shape: f32[4,80,80], index: 2, kind: input, shape index: {}]   ;;  %s2665_s3 = inlined_call_operand.vmem [shape: f32[32,1], index: 3, kind: input, shape index: {}]   ;;  %s2666_s4 = inlined_call_operand.vmem [shape: f32[32,4], index: 4, kind: input, shape index: {}]   ;;  %s2667_s5 = inlined_call_operand.vmem [shape: f32[32,1], index: 5, kind: input, shape index: {}]   ;;  %s2668_s6 = inlined_call_operand.vmem [shape: f32[32,1], index: 6, kind: input, shape index: {}]   ;;  %s2669_s7 = inlined_call_operand.vmem [shape: f32[80,42], index: 7, kind: input, shape index: {}]   ;;  %s2670_s8 = inlined_call_operand.vmem [shape: f32[32,3], index: 8, kind: input, shape index: {}]   ;;  %s2671_s9 = inlined_call_operand.vmem [shape: f32[32,32], index: 9, kind: input, shape index: {}]   ;;  %s2672_s10 = inlined_call_operand.vmem [shape: f32[32,1], index: 10, kind: input, shape index: {}]   ;;  %s2673_s11 = inlined_call_operand.vmem [shape: f32[32,1], index: 11, kind: input, shape index: {}]   ;;  %s2674_s12 = inlined_call_operand.vmem [shape: f32[40,8], index: 12, kind: input, shape index: {}]   ;;  %s2675_s13 = inlined_call_operand.vmem [shape: f32[32,24], index: 13, kind: input, shape index: {}]   ;;  %s2676_s14 = inlined_call_operand.vmem [shape: f32[24,3], index: 14, kind: input, shape index: {}]   ;;  %s2677_s15 = inlined_call_operand.vmem [shape: f32[2,32], index: 15, kind: input, shape index: {}]   ;;  %s2678_s16 = inlined_call_operand.vmem [shape: f32[1,3], index: 16, kind: input, shape index: {}]   ;;  %s2679_s17 = inlined_call_operand.hbm [shape: f32[2,3], index: 17, kind: output, shape index: {}]  }
   0x1   :  { %2682 = sst [smem:[#allocation5_spill]] %s2662_s0 }
   0x2   :  { %2683 = sst [smem:[#allocation6_spill]] %s2663_s1 }
   0x3   :  { %s2684_s26 = sld [smem:[#allocation5_spill]]  ;;  %s2685_s30 = sld [smem:[#allocation6_spill]]  ;;  %vm63_vm0 = vcmask 130048   ;;  %v2128_v4 = vmov 0   ;;  %v2244_v5 = vld [vmem:[%s2666_s4 + $0x10] sm:$0xff]  ;;  %v161_v6 = vld [vmem:[%s2666_s4] sm:$0xff] }
   0x4   :  { %2069 = vset.pattern.permute.xlu1 %v2128_v4  ;;  %2068 = vset.pattern.permute.xlu0 %v2128_v4 }
   0x5   :  { %177 = vperm.xlu1 %2069, %v2244_v5  }
   0x9   :  { %v57_v0 = vld [vmem:[%s2684_s26] sm:$0xff]  ;;  %v58_v1 = vld [vmem:[%s2684_s26 + $0x8] sm:$0xff] }
   0xa   :  { %v59_v2 = vld [vmem:[%s2685_s30] sm:$0xff]  ;;  %v1914_v3 = vpack.c.bf16 %v58_v1, %v57_v0 }
   0xb   :  { %1725 = vmatprep.mubr.msk.f32.mxu0 %vm63_vm0, %v59_v2 }
   0xc   :  { %1915 = vmatprep.subr.bf16.mxu0 %v1914_v3 }
   0xd   :  { %22 = vsyncpa [#allocation3], 0  ;;  %1917 = vmatpush3.bf16.msra.mxu0 %v1914_v3  ;;  %v60_v7 = vld [vmem:[%s2685_s30 + $0x8] sm:$0xff]  ;;  %v2257_v8 = vld [vmem:[%s2666_s4 + $0x18] sm:$0xff]  ;;  %167 = vperm.xlu0 %2068, %v161_v6   ;;  %v2129_v15 = vmov 2   ;;  %v2130_v28 = vmov 1  }
   0xe   :  { %v61_v9 = vld [vmem:[%s2685_s30 + $0x10] sm:$0xff]  ;;  %v189_v10 = vld [vmem:[%s2664_s2] sm:$0xff]  ;;  %v190_v11 = vld [vmem:[%s2664_s2 + $0x8] sm:$0xff]  ;;  %182 = vperm.xlu1 %2069, %v2257_v8   ;;  %v2131_v32 = vmov 3   ;;  %vm230_vm1 = vcmask 654336   ;;  %s2133_s22 = smov 126  }
   0xf   :  { %v2273_v12 = vld [vmem:[%s2666_s4 + $0x8] sm:$0xff]  ;;  %v1938_v13 = vpack.c.bf16 %v190_v11, %v189_v10  ;;  %v62_v14 = vld [vmem:[%s2685_s30 + $0x18] sm:$0xff]  ;;  %v1544_v16 = vld [vmem:[%s2664_s2 + $0x50] sm:$0xff]  ;;  %vm1016_vm6 = vcmask 261120   ;;  %vm1199_vm7 = vcmask 326656   ;;  %s2134_s20 = smov 8  }
  0x10   :  { %1726 = vmatmul.mubr.msk.f32.vlgmr.msra.gmra.mrb[0].mxu0 %vm63_vm0, %v60_v7  ;;  %v1545_v17 = vld [vmem:[%s2664_s2 + $0x58] sm:$0xff]  ;;  %v191_v18 = vld [vmem:[%s2664_s2 + $0x10] sm:$0xff]  ;;  %v1546_v22 = vld [vmem:[%s2664_s2 + $0x60] sm:$0xff]  ;;  %vm1325_vm12 = vcmask 64512   ;;  %vm1345_vm13 = vcmask 195584   ;;  %vm2137_vm14 = vmmov 0  }
  0x11   :  { %1728 = vmatprep.mubr.msk.f32.mxu0 %vm63_vm0, %v61_v9  ;;  %172 = vperm.xlu0 %2068, %v2273_v12   ;;  %v1918_v19 = vpack.c.bf16 %v1545_v17, %v1544_v16  ;;  %v192_v20 = vld [vmem:[%s2664_s2 + $0x18] sm:$0xff]  ;;  %v1547_v23 = vld [vmem:[%s2664_s2 + $0x68] sm:$0xff]  ;;  %v193_v24 = vld [vmem:[%s2664_s2 + $0x20] sm:$0xff]  ;;  %s2139_s24 = smov [#allocation2]   ;;  %vm1524_vm15 = vcmask 17408  }
  0x12   :  { %1939 = vmatprep.subr.bf16.mxu1 %v1938_v13  ;;  %2071 = vset.pattern.permute.xlu1 %v2129_v15  ;;  %v1942_v21 = vpack.c.bf16 %v192_v20, %v191_v18  ;;  %v1922_v25 = vpack.c.bf16 %v1547_v23, %v1546_v22  ;;  %v194_v26 = vld [vmem:[%s2664_s2 + $0x28] sm:$0xff]  ;;  %v1548_v29 = vld [vmem:[%s2664_s2 + $0x70] sm:$0xff]  ;;  %v1549_v30 = vld [vmem:[%s2664_s2 + $0x78] sm:$0xff]  ;;  %s1532_s25 = sshll.u32 %s2139_s24, 4  ;;  %s1533_s25 = int_to_ptr.vmem [resolvable:$true] %s1532_s25 }
  0x13   :  { %1941 = vmatpush3.bf16.msra.mxu1 %v1938_v13  ;;  %430 = vperm.xlu1 %2071, %v2273_v12   ;;  %v1946_v27 = vpack.c.bf16 %v194_v26, %v193_v24  ;;  %v195_v31 = vld [vmem:[%s2664_s2 + $0x30] sm:$0xff]  ;;  %v1926_v33 = vpack.c.bf16 %v1549_v30, %v1548_v29  ;;  %v196_v34 = vld [vmem:[%s2664_s2 + $0x38] sm:$0xff]  ;;  %v1550_v36 = vld [vmem:[%s2664_s2 + $0x80] sm:$0xff]  ;;  %s2104_s30 = scalar_lea.vmem %s1533_s25, 32  ;;  %p2109_p1 = scmp.lt.s32.totalorder %s1533_s25, %s1533_s25 }
  0x14   :  { %1729 = vmatmul.mubr.msk.f32.gmra.mrb[2].mxu0 %vm63_vm0, %v62_v14  ;;  %1919 = vmatprep.subr.bf16.mxu0 %v1918_v19  ;;  %v1950_v35 = vpack.c.bf16 %v196_v34, %v195_v31  ;;  %v1551_v37 = vld [vmem:[%s2664_s2 + $0x88] sm:$0xff]  ;;  %v197_v38 = vld [vmem:[%s2664_s2 + $0x40] sm:$0xff]  ;;  %v1552_v42 = vld [vmem:[%s2664_s2 + $0x90] sm:$0xff]  ;;  %p2105_p0 = scmp.ne.s32.totalorder %s1533_s25, %s2104_s30  ;;  %p2110_p2 = scmp.lt.s32.totalorder %s2104_s30, %s2104_s30 }
  0x15   :  { %2070 = vset.pattern.permute.xlu0 %v2129_v15  ;;  %1921 = vmatpush3.bf16.msra.mxu0 %v1918_v19  ;;  %v1930_v39 = vpack.c.bf16 %v1551_v37, %v1550_v36  ;;  %v198_v40 = vld [vmem:[%s2664_s2 + $0x48] sm:$0xff]  ;;  %v1553_v43 = vld [vmem:[%s2664_s2 + $0x98] sm:$0xff]  ;;  %v1562_v45 = vld [vmem:[%s2664_s2 + $0xa0] sm:$0xff] }
  0x16   :  { %426 = vperm.xlu0 %2070, %v161_v6   ;;  %1943 = vmatprep.subr.bf16.mxu1 %v1942_v21  ;;  %v1954_v41 = vpack.c.bf16 %v198_v40, %v197_v38  ;;  %v1934_v44 = vpack.c.bf16 %v1553_v43, %v1552_v42  ;;  %v1563_v46 = vld [vmem:[%s2664_s2 + $0xa8] sm:$0xff]  ;;  %v689_v48 = vld [vmem:[%s2665_s3] sm:$0xff]  ;;  %v691_v54 = vld [vmem:[%s2665_s3 + $0x10] sm:$0xff]  ;;  %p2111_p3 = por %p2110_p2, %p2109_p1 }
  0x17   :  { %434 = vperm.xlu1 %2071, %v2244_v5   ;;  %1945 = vmatpush3.bf16.msra.mxu1 %v1942_v21  ;;  %v2357_v47 = vpack.c.bf16 %v1563_v46, %v1562_v45  ;;  %v717_v49 = vld [vmem:[%s2667_s5] sm:$0xff]  ;;  %v690_v50 = vld [vmem:[%s2665_s3 + $0x8] sm:$0xff]  ;;  %v720_v55 = vld [vmem:[%s2667_s5 + $0x18] sm:$0xff] }
  0x18   :  { %1923 = vmatprep.subr.bf16.mxu0 %v1922_v25  ;;  %1947 = vmatprep.subr.bf16.mxu1 %v1946_v27  ;;  %v745_v51 = vld [vmem:[%s2668_s6] sm:$0xff]  ;;  %v718_v52 = vld [vmem:[%s2667_s5 + $0x8] sm:$0xff]  ;;  %v692_v56 = vld [vmem:[%s2665_s3 + $0x18] sm:$0xff]  ;;  %s2135_s3 = smov 16   ;;  %p2112_p4 = pnand %p2111_p3, %p2105_p0 }
  0x19   :  { %1925 = vmatpush3.bf16.msra.mxu0 %v1922_v25  ;;  %v746_v53 = vld [vmem:[%s2668_s6 + $0x8] sm:$0xff]  ;;  %v748_v57 = vld [vmem:[%s2668_s6 + $0x18] sm:$0xff]  ;;  %v719_v58 = vld [vmem:[%s2667_s5 + $0x10] sm:$0xff] }
  0x1a   :  { %438 = vperm.xlu0 %2070, %v2257_v8   ;;  %1927 = vmatprep.subr.bf16.mxu0 %v1926_v33  ;;  %v747_v59 = vld [vmem:[%s2668_s6 + $0x10] sm:$0xff]  ;;  %v1565_v11 = vld [vmem:[%s2664_s2 + $0xb8] sm:$0xff]  ;;  %v1566_v22 = vld [vmem:[%s2664_s2 + $0xc0] sm:$0xff] }
  0x1b   :  { %2072 = vset.pattern.permute.xlu1 %v2130_v28  ;;  %1949 = vmatpush3.bf16.msra.mxu1 %v1946_v27  ;;  %v1564_v10 = vld [vmem:[%s2664_s2 + $0xb0] sm:$0xff]  ;;  %v1567_v23 = vld [vmem:[%s2664_s2 + $0xc8] sm:$0xff]  ;;  %v1569_v34 = vld [vmem:[%s2664_s2 + $0xd8] sm:$0xff] }
  0x1c   :  { %200 = vperm.xlu1 %2072, %v161_v6   ;;  %1951 = vmatprep.subr.bf16.mxu1 %v1950_v35  ;;  %v1962_v20 = vpack.c.bf16 %v1565_v11, %v1564_v10  ;;  %v1966_v31 = vpack.c.bf16 %v1567_v23, %v1566_v22  ;;  %v1570_v36 = vld [vmem:[%s2664_s2 + $0xe0] sm:$0xff]  ;;  %v1571_v37 = vld [vmem:[%s2664_s2 + $0xe8] sm:$0xff]  ;;  %v1577_v40 = vld [vmem:[%s2664_s2 + $0xf8] sm:$0xff] }
  0x1d   :  { %1929 = vmatpush3.bf16.msra.mxu0 %v1926_v33  ;;  %v1568_v33 = vld [vmem:[%s2664_s2 + $0xd0] sm:$0xff]  ;;  %v1974_v38 = vpack.c.bf16 %v1571_v37, %v1570_v36  ;;  %v1578_v42 = vld [vmem:[%s2664_s2 + $0x100] sm:$0xff]  ;;  %v1579_v43 = vld [vmem:[%s2664_s2 + $0x108] sm:$0xff] }
  0x1e   :  { %2073 = vset.pattern.permute.xlu0 %v2131_v32  ;;  %1931 = vmatprep.subr.bf16.mxu0 %v1930_v39  ;;  %v1982_v45 = vpack.c.bf16 %v1579_v43, %v1578_v42  ;;  %v805_v11 = vld [vmem:[%s2669_s7 + $0x40] sm:$0xff] }
  0x1f   :  { %558 = vperm.xlu0 %2073, %v161_v6   ;;  %1953 = vmatpush3.bf16.msra.mxu1 %v1950_v35  ;;  %v1970_v35 = vpack.c.bf16 %v1569_v34, %v1568_v33 }
  0x20   :  { %204 = vperm.xlu1 %2072, %v2273_v12   ;;  %1955 = vmatprep.subr.bf16.mxu1 %v1954_v41 }
  0x21   :  { %1933 = vmatpush3.bf16.msra.mxu0 %v1930_v39  ;;  %v1576_v39 = vld [vmem:[%s2664_s2 + $0xf0] sm:$0xff] }
  0x22   :  { %1935 = vmatprep.subr.bf16.mxu0 %v1934_v44 }
  0x23   :  { %2075 = vset.pattern.permute.xlu0 %v2130_v28  ;;  %1957 = vmatpush3.bf16.msra.mxu1 %v1954_v41  ;;  %v1978_v41 = vpack.c.bf16 %v1577_v40, %v1576_v39 }
  0x24   :  { %208 = vperm.xlu0 %2075, %v2244_v5   ;;  %2074 = vset.pattern.permute.xlu1 %v2131_v32 }
  0x25   :  { %562 = vperm.xlu1 %2074, %v2273_v12   ;;  %1937 = vmatpush3.bf16.msra.mxu0 %v1934_v44 }
  0x26   :  { %1959 = vmatprep.subr.bf16.mxu1 %v2357_v47 }
  0x28   :  { %2077 = vset.pattern.permute.xlu0 %v2131_v32 }
  0x29   :  { %570 = vperm.xlu0 %2077, %v2257_v8   ;;  %566 = vperm.xlu1 %2074, %v2244_v5  }
  0x2d   :  { %2079 = vset.pattern.permute.xlu0 %v2128_v4  ;;  %2076 = vset.pattern.permute.xlu1 %v2130_v28 }
  0x2e   :  { %212 = vperm.xlu1 %2076, %v2257_v8   ;;  %723 = vperm.xlu0 %2079, %v717_v49  }
  0x32   :  { %2078 = vset.pattern.permute.xlu1 %v2128_v4  ;;  %751 = vperm.xlu0 %2079, %v745_v51  }
  0x33   :  { %695 = vperm.xlu1 %2078, %v689_v48   ;;  %v1581_v48 = vld [vmem:[%s2664_s2 + $0x118] sm:$0xff] }
  0x36   :  { %756 = vperm.xlu0 %2079, %v746_v53   ;;  %v1583_v53 = vld [vmem:[%s2664_s2 + $0x128] sm:$0xff] }
  0x37   :  { %700 = vperm.xlu1 %2078, %v690_v50  }
  0x3a   :  { %738 = vperm.xlu0 %2079, %v720_v55   ;;  %v1584_v55 = vld [vmem:[%s2664_s2 + $0x130] sm:$0xff] }
  0x3b   :  { %728 = vperm.xlu1 %2078, %v718_v52   ;;  %v1582_v52 = vld [vmem:[%s2664_s2 + $0x120] sm:$0xff] }
  0x3e   :  { %766 = vperm.xlu0 %2079, %v748_v57  }
  0x3f   :  { %705 = vperm.xlu1 %2078, %v691_v54   ;;  %v1990_v54 = vpack.c.bf16 %v1583_v53, %v1582_v52 }
  0x42   :  { %2081 = vset.pattern.permute.xlu0 %v2130_v28 }
  0x43   :  { %710 = vperm.xlu1 %2078, %v692_v56   ;;  %v1585_v56 = vld [vmem:[%s2664_s2 + $0x138] sm:$0xff] }
  0x44   :  { %v1994_v57 = vpack.c.bf16 %v1585_v56, %v1584_v55 }
  0x47   :  { %733 = vperm.xlu1 %2078, %v719_v58  }
  0x4b   :  { %761 = vperm.xlu1 %2078, %v747_v59  }
  0x4f   :  { %2080 = vset.pattern.permute.xlu1 %v2130_v28 }
  0x84   :  { %v178_v60 = vpop.permute.xlu1 %177 }
  0x8c   :  { %v168_v0 = vpop.permute.xlu0 %167 }
  0x8d   :  { %v183_v61 = vpop.permute.xlu1 %182 }
  0x90   :  { %v173_v2 = vpop.permute.xlu0 %172 }
  0x92   :  { %v431_v62 = vpop.permute.xlu1 %430 }
  0x95   :  { %v427_v5 = vpop.permute.xlu0 %426 }
  0x96   :  { %v2398_v63 = vpop.permute.xlu1 %434 }
  0x99   :  { %v2402_v7 = vpop.permute.xlu0 %438 }
  0x9b   :  { %v201_v1 = vpop.permute.xlu1 %200 }
  0x9e   :  { %v559_v12 = vpop.permute.xlu0 %558 }
  0x9f   :  { %v205_v3 = vpop.permute.xlu1 %204 }
  0xa3   :  { %v209_v26 = vpop.permute.xlu0 %208 }
  0xa4   :  { %v2400_v6 = vpop.permute.xlu1 %562 }
  0xa8   :  { %v2404_v8 = vpop.permute.xlu1 %566 }
  0xad   :  { %v213_v17 = vpop.permute.xlu1 %212 }
  0xb2   :  { %v696_v23 = vpop.permute.xlu1 %695 }
  0xe3   :  { %v2406_v9 = vpop.f32.mrb[0].mxu0 }
  0xe4   :  { %v142_v13 = vpop.f32.mrb[1].mxu0  ;;  %v186_v18 = vmul.f32 %v2406_v9, %v173_v2  ;;  %v216_v19 = vmul.f32 %v2406_v9, %v205_v3  ;;  %v442_v44 = vmul.f32 %v2406_v9, %v431_v62  ;;  %v574_v58 = vmul.f32 %v2406_v9, %v2400_v6  ;;  %v797_v62 = vld [vmem:[%s2669_s7] sm:$0xff]  ;;  %v800_v2 = vld [vmem:[%s2669_s7 + $0x18] sm:$0xff]  ;;  %v802_v6 = vld [vmem:[%s2669_s7 + $0x28] sm:$0xff] }
  0xe5   :  { %v215_v14 = vmul.f32 %v201_v1, %v142_v13  ;;  %v185_v16 = vmul.f32 %v168_v0, %v142_v13  ;;  %v441_v32 = vmul.f32 %v427_v5, %v142_v13  ;;  %v573_v51 = vmul.f32 %v559_v12, %v142_v13  ;;  %v799_v1 = vld [vmem:[%s2669_s7 + $0x10] sm:$0xff]  ;;  %v801_v5 = vld [vmem:[%s2669_s7 + $0x20] sm:$0xff]  ;;  %v804_v9 = vld [vmem:[%s2669_s7 + $0x38] sm:$0xff] }
  0xe6   :  { %v2002_v3 = vpack.c.bf16 %v800_v2, %v799_v1  ;;  %v806_v12 = vld [vmem:[%s2669_s7 + $0x48] sm:$0xff] }
  0xe7   :  { %v2416_v21 = vpop.f32.mrb[2].mxu0  ;;  %1751 = vmatprep.mubr.msk.f32.mxu0 %vm230_vm1, %v215_v14  ;;  %1777 = vmatprep.mubr.msk.f32.mxu1 %vm230_vm1, %v185_v16  ;;  %v2014_v13 = vpack.c.bf16 %v806_v12, %v805_v11  ;;  %v904_v14 = vld [vmem:[%s2670_s8] sm:$0xff]  ;;  %v905_v16 = vld [vmem:[%s2670_s8 + $0x8] sm:$0xff] }
  0xe8   :  { %v188_v24 = vmul.f32 %v2416_v21, %v183_v61  ;;  %v2427_v25 = vpop.f32.mrb[3].mxu0  ;;  %1752 = vmatmul.mubr.msk.f32.vlgmr.msra.gmra.mrb[4].mxu0 %vm230_vm1, %v216_v19  ;;  %1778 = vmatmul.mubr.msk.f32.vlgmr.msra.gmra.mrb[0].mxu1 %vm230_vm1, %v186_v18  ;;  %v218_v27 = vmul.f32 %v2416_v21, %v213_v17  ;;  %v444_v49 = vmul.f32 %v2416_v21, %v2402_v7  ;;  %v803_v7 = vld [vmem:[%s2669_s7 + $0x30] sm:$0xff]  ;;  %v907_v18 = vld [vmem:[%s2670_s8 + $0x18] sm:$0xff] }
  0xe9   :  { %v187_v29 = vmul.f32 %v178_v60, %v2427_v25  ;;  %1961 = vmatpush3.bf16.msra.mxu1 %v2357_v47  ;;  %v217_v30 = vmul.f32 %v209_v26, %v2427_v25  ;;  %v443_v46 = vmul.f32 %v2398_v63, %v2427_v25  ;;  %v1580_v47 = vld [vmem:[%s2664_s2 + $0x110] sm:$0xff]  ;;  %v575_v59 = vmul.f32 %v2404_v8, %v2427_v25  ;;  %v571_v60 = vpop.permute.xlu0 %570  ;;  %v798_v63 = vld [vmem:[%s2669_s7 + $0x8] sm:$0xff] }
  0xea   :  { %1963 = vmatprep.subr.bf16.mxu1 %v1962_v20  ;;  %v1986_v50 = vpack.c.bf16 %v1581_v48, %v1580_v47  ;;  %v576_v61 = vmul.f32 %v2416_v21, %v571_v60  ;;  %v1998_v0 = vpack.c.bf16 %v798_v63, %v797_v62  ;;  %v2006_v8 = vpack.c.bf16 %v802_v6, %v801_v5  ;;  %v906_v17 = vld [vmem:[%s2670_s8 + $0x10] sm:$0xff]  ;;  %s2132_s8 = smov 127  }
  0xeb   :  { %1780 = vmatprep.mubr.msk.f32.mxu1 %vm230_vm1, %v187_v29  ;;  %1754 = vmatprep.mubr.msk.f32.mxu0 %vm230_vm1, %v217_v30  ;;  %v2010_v10 = vpack.c.bf16 %v804_v9, %v803_v7 }
  0xec   :  { %1781 = vmatmul.mubr.msk.f32.gmra.mrb[2].mxu1 %vm230_vm1, %v188_v24  ;;  %1755 = vmatmul.mubr.msk.f32.gmra.mrb[6].mxu0 %vm230_vm1, %v218_v27  ;;  %v701_v24 = vpop.permute.xlu1 %700 }
  0xed   :  { %1965 = vmatpush3.bf16.msra.mxu1 %v1962_v20  ;;  %1803 = vmatprep.mubr.msk.f32.mxu1 %vm230_vm1, %v441_v32  ;;  %v724_v25 = vpop.permute.xlu0 %723 }
  0xee   :  { %1967 = vmatprep.subr.bf16.mxu1 %v1966_v31  ;;  %1999 = vmatprep.subr.bf16.mxu0 %v1998_v0 }
  0xef   :  { %2001 = vmatpush3.bf16.msra.mxu0 %v1998_v0  ;;  %933 = vperm.xlu1 %2080, %v904_v14  }
  0xf0   :  { %2003 = vmatprep.subr.bf16.mxu0 %v2002_v3  ;;  %937 = vperm.xlu0 %2081, %v905_v16  }
  0xf1   :  { %1969 = vmatpush3.bf16.msra.mxu1 %v1966_v31  ;;  %v752_v26 = vpop.permute.xlu0 %751 }
  0xf2   :  { %1971 = vmatprep.subr.bf16.mxu1 %v1970_v35 }
  0xf3   :  { %2005 = vmatpush3.bf16.msra.mxu0 %v2002_v3  ;;  %2082 = vset.pattern.permute.xlu1 %v2129_v15 }
  0xf4   :  { %2007 = vmatprep.subr.bf16.mxu0 %v2006_v8  ;;  %941 = vperm.xlu0 %2081, %v906_v17  }
  0xf5   :  { %1973 = vmatpush3.bf16.msra.mxu1 %v1970_v35  ;;  %973 = vperm.xlu1 %2082, %v904_v14   ;;  %v757_v29 = vpop.permute.xlu0 %756 }
  0xf6   :  { %1975 = vmatprep.subr.bf16.mxu1 %v1974_v38 }
  0xf7   :  { %2009 = vmatpush3.bf16.msra.mxu0 %v2006_v8 }
  0xf8   :  { %2011 = vmatprep.subr.bf16.mxu0 %v2010_v10  ;;  %2084 = vset.pattern.permute.xlu0 %v2129_v15 }
  0xf9   :  { %1977 = vmatpush3.bf16.msra.mxu1 %v1974_v38  ;;  %977 = vperm.xlu1 %2082, %v905_v16   ;;  %v739_v34 = vpop.permute.xlu0 %738 }
  0xfa   :  { %1979 = vmatprep.subr.bf16.mxu1 %v1978_v41  ;;  %981 = vperm.xlu0 %2084, %v906_v17  }
  0xfb   :  { %2013 = vmatpush3.bf16.msra.mxu0 %v2010_v10 }
  0xfc   :  { %1804 = vmatmul.mubr.msk.f32.vlgmr.msra.gmra.mrb[0].mxu1 %vm230_vm1, %v442_v44  ;;  %2015 = vmatprep.subr.bf16.mxu0 %v2014_v13 }
  0xfd   :  { %1806 = vmatprep.mubr.msk.f32.mxu1 %vm230_vm1, %v443_v46  ;;  %1981 = vmatpush3.bf16.msra.mxu1 %v1978_v41 }
  0xfe   :  { %1983 = vmatprep.subr.bf16.mxu1 %v1982_v45  ;;  %2083 = vset.pattern.permute.xlu1 %v2130_v28  ;;  %v729_v28 = vpop.permute.xlu1 %728 }
  0xff   :  { %2017 = vmatpush3.bf16.msra.mxu0 %v2014_v13  ;;  %2087 = vset.pattern.permute.xlu0 %v2128_v4 }
 0x100   :  { %1807 = vmatmul.mubr.msk.f32.gmra.mrb[2].mxu1 %vm230_vm1, %v444_v49  ;;  %945 = vperm.xlu1 %2083, %v907_v18   ;;  %v767_v49 = vpop.permute.xlu0 %766 }
 0x101   :  { %1985 = vmatpush3.bf16.msra.mxu1 %v1982_v45  ;;  %1829 = vmatprep.mubr.msk.f32.mxu1 %vm230_vm1, %v573_v51 }
 0x102   :  { %1987 = vmatprep.subr.bf16.mxu1 %v1986_v50  ;;  %915 = vperm.xlu0 %2087, %v905_v16   ;;  %v706_v27 = vpop.permute.xlu1 %705 }
 0x104   :  { %2085 = vset.pattern.permute.xlu1 %v2129_v15 }
 0x105   :  { %1989 = vmatpush3.bf16.msra.mxu1 %v1986_v50  ;;  %985 = vperm.xlu1 %2085, %v907_v18  }
 0x106   :  { %1991 = vmatprep.subr.bf16.mxu1 %v1990_v54  ;;  %v711_v30 = vpop.permute.xlu1 %710 }
 0x109   :  { %1993 = vmatpush3.bf16.msra.mxu1 %v1990_v54  ;;  %2086 = vset.pattern.permute.xlu1 %v2128_v4 }
 0x10a   :  { %1995 = vmatprep.subr.bf16.mxu1 %v1994_v57  ;;  %910 = vperm.xlu1 %2086, %v904_v14   ;;  %v734_v37 = vpop.permute.xlu1 %733 }
 0x10d   :  { %1997 = vmatpush3.bf16.msra.mxu1 %v1994_v57 }
 0x10e   :  { %920 = vperm.xlu1 %2086, %v906_v17   ;;  %v762_v52 = vpop.permute.xlu1 %761 }
 0x110   :  { %1830 = vmatmul.mubr.msk.f32.vlgmr.msra.gmra.mrb[0].mxu1 %vm230_vm1, %v574_v58 }
 0x111   :  { %1832 = vmatprep.mubr.msk.f32.mxu1 %vm230_vm1, %v575_v59 }
 0x112   :  { %925 = vperm.xlu1 %2086, %v907_v18  }
 0x114   :  { %1833 = vmatmul.mubr.msk.f32.gmra.mrb[2].mxu1 %vm230_vm1, %v576_v61 }
 0x16e   :  { %v934_v10 = vpop.permute.xlu1 %933 }
 0x16f   :  { %v938_v12 = vpop.permute.xlu0 %937 }
 0x174   :  { %v974_v11 = vpop.permute.xlu1 %973 }
 0x178   :  { %v978_v13 = vpop.permute.xlu1 %977 }
 0x1bb   :  { %v1753_v19 = vpop.f32.mrb[4].mxu0 }
 0x1bc   :  { %v309_v20 = vpop.f32.mrb[5].mxu0 }
 0x1bf   :  { %v1756_v21 = vpop.f32.mrb[6].mxu0 }
 0x1c0   :  { %v319_v22 = vpop.f32.mrb[7].mxu0 }
 0x1e3   :  { %v1831_v31 = vpop.f32.mrb[0].mxu1 }
 0x1e4   :  { %v2044_v15 = vadd.f32 %v1831_v31, %v1753_v19  ;;  %v666_v32 = vpop.f32.mrb[1].mxu1 }
 0x1e5   :  { %v2045_v33 = vadd.f32 %v666_v32, %v309_v20  ;;  %v1114_v32 = vld [vmem:[%s2672_s10] sm:$0xff] }
 0x1e6   :  { %v714_v4 = vadd.f32 %v2044_v15, %v701_v24  ;;  %v942_v24 = vpop.permute.xlu0 %941  ;;  %v1115_v15 = vld [vmem:[%s2672_s10 + $0x8] sm:$0xff] }
 0x1e7   :  { %v713_v35 = vadd.f32 %v2045_v33, %v696_v23  ;;  %v1834_v36 = vpop.f32.mrb[2].mxu1  ;;  %v1143_v33 = vld [vmem:[%s2673_s11 + $0x8] sm:$0xff] }
 0x1e8   :  { %v742_v38 = vmul.f32 %v729_v28, %v714_v4  ;;  %v2046_v39 = vadd.f32 %v1834_v36, %v1756_v21  ;;  %v676_v40 = vpop.f32.mrb[3].mxu1  ;;  %v1142_v4 = vld [vmem:[%s2673_s11] sm:$0xff]  ;;  %v1145_v36 = vld [vmem:[%s2673_s11 + $0x18] sm:$0xff] }
 0x1e9   :  { %v741_v41 = vmul.f32 %v724_v25, %v713_v35  ;;  %v2047_v42 = vadd.f32 %v676_v40, %v319_v22  ;;  %v946_v22 = vpop.permute.xlu1 %945  ;;  %v1012_v25 = vld [vmem:[%s2671_s9] sm:$0xff]  ;;  %v1116_v35 = vld [vmem:[%s2672_s10 + $0x10] sm:$0xff] }
 0x1ea   :  { %v770_v43 = vadd.f32 %v757_v29, %v742_v38  ;;  %v716_v44 = vadd.f32 %v2046_v39, %v711_v30  ;;  %1869 = vmatprep.mubr.msk.f32.mxu1 %vm1016_vm6, %v1012_v25  ;;  %v982_v29 = vpop.permute.xlu0 %981 }
 0x1eb   :  { %v769_v45 = vadd.f32 %v752_v26, %v741_v41  ;;  %v715_v46 = vadd.f32 %v2047_v42, %v706_v27 }
 0x1ec   :  { %v778_v47 = vmin.f32 %v770_v43, 0.0  ;;  %v744_v48 = vmul.f32 %v739_v34, %v716_v44  ;;  %vm774_vm3 = vcmp.gt.f32.partialorder %v770_v43, 0.0  ;;  %v1117_v34 = vld [vmem:[%s2672_s10 + $0x18] sm:$0xff] }
 0x1ed   :  { %v777_v50 = vmin.f32 %v769_v45, 0.0  ;;  %v743_v51 = vmul.f32 %v734_v37, %v715_v46  ;;  %vm773_vm2 = vcmp.gt.f32.partialorder %v769_v45, 0.0  ;;  %v986_v27 = vpop.permute.xlu1 %985  ;;  %v1144_v37 = vld [vmem:[%s2673_s11 + $0x10] sm:$0xff] }
 0x1ee   :  { %v783_v53 = vmul.f32 1.442695, %v778_v47  ;;  %v772_v54 = vadd.f32 %v767_v49, %v744_v48  ;;  %v916_v41 = vpop.permute.xlu0 %915 }
 0x1ef   :  { %v771_v55 = vadd.f32 %v762_v52, %v743_v51  ;;  %v781_v56 = vmul.f32 1.442695, %v777_v50 }
 0x1f0   :  { %2088 = vpow2.f32 %v783_v53  ;;  %v780_v57 = vmin.f32 %v772_v54, 0.0  ;;  %vm776_vm5 = vcmp.gt.f32.partialorder %v772_v54, 0.0 }
 0x1f1   :  { %v779_v58 = vmin.f32 %v771_v55, 0.0  ;;  %2090 = vpow2.f32 %v781_v56  ;;  %vm775_vm4 = vcmp.gt.f32.partialorder %v771_v55, 0.0  ;;  %v911_v38 = vpop.permute.xlu1 %910 }
 0x1f2   :  { %v787_v59 = vmul.f32 1.442695, %v780_v57 }
 0x1f3   :  { %v785_v60 = vmul.f32 1.442695, %v779_v58 }
 0x1f4   :  { %2092 = vpow2.f32 %v787_v59 }
 0x1f5   :  { %2094 = vpow2.f32 %v785_v60  ;;  %v921_v39 = vpop.permute.xlu1 %920 }
 0x1f9   :  { %v926_v40 = vpop.permute.xlu1 %925 }
 0x1fa   :  { %v2089_v61 = vpop.eup %2088 }
 0x1fb   :  { %v2091_v62 = vpop.eup %2090  ;;  %v1591_v63 = vadd.f32 -1.0, %v2089_v61 }
 0x1fc   :  { %v1590_v0 = vadd.f32 -1.0, %v2091_v62 }
 0x1fd   :  { %v794_v5 = vsel %vm774_vm3, %v770_v43, %v1591_v63 }
 0x1fe   :  { %v2093_v1 = vpop.eup %2092  ;;  %v793_v2 = vsel %vm773_vm2, %v769_v45, %v1590_v0  ;;  %v1013_v0 = vld [vmem:[%s2671_s9 + $0x8] sm:$0xff] }
 0x1ff   :  { %v2095_v3 = vpop.eup %2094  ;;  %1855 = vmatprep.mubr.msk.f32.mxu0 %vm230_vm1, %v793_v2  ;;  %v1593_v6 = vadd.f32 -1.0, %v2093_v1  ;;  %v1014_v1 = vld [vmem:[%s2671_s9 + $0x10] sm:$0xff]  ;;  %v1015_v2 = vld [vmem:[%s2671_s9 + $0x18] sm:$0xff] }
 0x200   :  { %1856 = vmatmul.mubr.msk.f32.vlgmr.msra.gmra.mrb[8].mxu0 %vm230_vm1, %v794_v5  ;;  %v1592_v7 = vadd.f32 -1.0, %v2095_v3  ;;  %v1194_v3 = vld [vmem:[%s2674_s12] sm:$0xff]  ;;  %v1195_v5 = vld [vmem:[%s2674_s12 + $0x8] sm:$0xff] }
 0x201   :  { %v796_v9 = vsel %vm776_vm5, %v772_v54, %v1593_v6  ;;  %v2026_v6 = vpack.c.bf16 %v1195_v5, %v1194_v3 }
 0x202   :  { %v795_v8 = vsel %vm775_vm4, %v771_v55, %v1592_v7  ;;  %v1196_v7 = vld [vmem:[%s2674_s12 + $0x10] sm:$0xff] }
 0x203   :  { %1858 = vmatprep.mubr.msk.f32.mxu0 %vm230_vm1, %v795_v8  ;;  %2027 = vmatprep.subr.bf16.mxu0 %v2026_v6  ;;  %v1197_v8 = vld [vmem:[%s2674_s12 + $0x18] sm:$0xff] }
 0x204   :  { %1859 = vmatmul.mubr.msk.f32.gmra.mrb[10].mxu0 %vm230_vm1, %v796_v9  ;;  %v2030_v9 = vpack.c.bf16 %v1197_v8, %v1196_v7 }
 0x205   :  { %2029 = vmatpush3.bf16.msra.mxu0 %v2026_v6 }
 0x206   :  { %2031 = vmatprep.subr.bf16.mxu0 %v2030_v9 }
 0x209   :  { %2033 = vmatpush3.bf16.msra.mxu0 %v2030_v9 }
 0x2d3   :  { %v1857_v14 = vpop.f32.mrb[8].mxu0 }
 0x2d4   :  { %v949_v16 = vmul.f32 %v1857_v14, %v938_v12  ;;  %v885_v17 = vpop.f32.mrb[9].mxu0  ;;  %v989_v20 = vmul.f32 %v1857_v14, %v978_v13  ;;  %v929_v43 = vmul.f32 %v1857_v14, %v916_v41 }
 0x2d5   :  { %v948_v18 = vmul.f32 %v934_v10, %v885_v17  ;;  %v988_v23 = vmul.f32 %v974_v11, %v885_v17  ;;  %v928_v45 = vmul.f32 %v911_v38, %v885_v17  ;;  %v1198_v10 = vld [vmem:[%s2674_s12 + $0x20] sm:$0xff] }
 0x2d6   :  { %958 = vrot.lane.b32.xlu1 %v949_v16, %s2132_s8  ;;  %1883 = vmatprep.subr.mxu0 %v1198_v10 }
 0x2d7   :  { %956 = vrot.lane.b32.xlu0 %v948_v18, %s2132_s8  ;;  %v1860_v19 = vpop.f32.mrb[10].mxu0  ;;  %1884 = vmatpush3.msra.mxu0 %v1198_v10 }
 0x2d8   :  { %v895_v21 = vpop.f32.mrb[11].mxu0  ;;  %v951_v28 = vmul.f32 %v1860_v19, %v946_v22  ;;  %v991_v30 = vmul.f32 %v1860_v19, %v986_v27  ;;  %v931_v54 = vmul.f32 %v1860_v19, %v926_v40 }
 0x2d9   :  { %v950_v26 = vmul.f32 %v942_v24, %v895_v21  ;;  %v990_v31 = vmul.f32 %v982_v29, %v895_v21  ;;  %v930_v56 = vmul.f32 %v921_v39, %v895_v21 }
 0x2da   :  { %998 = vrot.lane.b32.xlu1 %v989_v20, %s2133_s22 }
 0x2db   :  { %996 = vrot.lane.b32.xlu0 %v988_v23, %s2133_s22 }
 0x2de   :  { %962 = vrot.lane.b32.xlu1 %v951_v28, %s2132_s8 }
 0x2df   :  { %960 = vrot.lane.b32.xlu0 %v950_v26, %s2132_s8 }
 0x2e2   :  { %1002 = vrot.lane.b32.xlu1 %v991_v30, %s2133_s22 }
 0x2e3   :  { %1000 = vrot.lane.b32.xlu0 %v990_v31, %s2133_s22 }
 0x2e6   :  { %1125 = vperm.xlu1 %2086, %v1115_v15  }
 0x2e7   :  { %1120 = vperm.xlu0 %2087, %v1114_v32  }
 0x2ea   :  { %1153 = vperm.xlu1 %2086, %v1143_v33  }
 0x2eb   :  { %1148 = vperm.xlu0 %2087, %v1142_v4  }
 0x2ee   :  { %1135 = vperm.xlu1 %2086, %v1117_v34  }
 0x2ef   :  { %1130 = vperm.xlu0 %2087, %v1116_v35  }
 0x2f2   :  { %1163 = vperm.xlu1 %2086, %v1145_v36  }
 0x2f3   :  { %1158 = vperm.xlu0 %2087, %v1144_v37  }
 0x348   :  { %v959_v42 = vpop.permute.xlu1 %958 }
 0x349   :  { %v957_v44 = vpop.permute.xlu0 %956  ;;  %v969_v46 = vadd.f32 %v959_v42, %v929_v43 }
 0x34a   :  { %v968_v47 = vadd.f32 %v957_v44, %v928_v45 }
 0x34c   :  { %v999_v48 = vpop.permute.xlu1 %998 }
 0x34d   :  { %v1009_v49 = vadd.f32 %v999_v48, %v969_v46  ;;  %v997_v50 = vpop.permute.xlu0 %996 }
 0x34e   :  { %v1008_v51 = vadd.f32 %v997_v50, %v968_v47  ;;  %v1342_v50 = vld [vmem:[%s2676_s14] sm:$0xff] }
 0x350   :  { %v2018_v52 = vpack.c.bf16 %v1009_v49, %v1008_v51  ;;  %v963_v53 = vpop.permute.xlu1 %962  ;;  %v1343_v51 = vld [vmem:[%s2676_s14 + $0x8] sm:$0xff] }
 0x351   :  { %v961_v55 = vpop.permute.xlu0 %960  ;;  %v971_v57 = vadd.f32 %v963_v53, %v931_v54  ;;  %v1344_v53 = vld [vmem:[%s2676_s14 + $0x10] sm:$0xff] }
 0x352   :  { %2019 = vmatprep.subr.bf16.mxu1 %v2018_v52  ;;  %v970_v58 = vadd.f32 %v961_v55, %v930_v56 }
 0x353   :  { %2021 = vmatpush3.bf16.msra.mxu1 %v2018_v52  ;;  %v2034_v52 = vpack.c.bf16 %v1343_v51, %v1342_v50 }
 0x354   :  { %v1003_v59 = vpop.permute.xlu1 %1002 }
 0x355   :  { %v1011_v60 = vadd.f32 %v1003_v59, %v971_v57  ;;  %v1001_v61 = vpop.permute.xlu0 %1000  ;;  %2035 = vmatprep.subr.bf16.mxu0 %v2034_v52 }
 0x356   :  { %v1010_v62 = vadd.f32 %v1001_v61, %v970_v58 }
 0x358   :  { %v2022_v63 = vpack.c.bf16 %v1011_v60, %v1010_v62  ;;  %v1334_v62 = vld [vmem:[%s2675_s13] sm:$0xff] }
 0x35a   :  { %2023 = vmatprep.subr.bf16.mxu1 %v2022_v63 }
 0x35b   :  { %2025 = vmatpush3.bf16.msra.mxu1 %v2022_v63 }
 0x35e   :  { %1870 = vmatmul.mubr.msk.f32.vlgmr.msra.gmra.mrb[4].mxu1 %vm1016_vm6, %v1013_v0  ;;  %v1335_v0 = vld [vmem:[%s2675_s13 + $0x8] sm:$0xff] }
 0x35f   :  { %1872 = vmatprep.mubr.msk.f32.mxu1 %vm1016_vm6, %v1014_v1 }
 0x362   :  { %1873 = vmatmul.mubr.msk.f32.gmra.mrb[6].mxu1 %vm1016_vm6, %v1015_v2 }
 0x365   :  { %v1126_v11 = vpop.permute.xlu1 %1125 }
 0x366   :  { %v1121_v12 = vpop.permute.xlu0 %1120 }
 0x369   :  { %v1154_v13 = vpop.permute.xlu1 %1153 }
 0x36a   :  { %v1149_v14 = vpop.permute.xlu0 %1148 }
 0x36d   :  { %v1136_v16 = vpop.permute.xlu1 %1135 }
 0x36e   :  { %v1131_v18 = vpop.permute.xlu0 %1130 }
 0x371   :  { %v1164_v27 = vpop.permute.xlu1 %1163 }
 0x372   :  { %v1159_v31 = vpop.permute.xlu0 %1158 }
 0x431   :  { %v1871_v17 = vpop.f32.mrb[4].mxu1 }
 0x432   :  { %v1139_v19 = vmul.f32 %v1871_v17, %v1126_v11  ;;  %v1095_v20 = vpop.f32.mrb[5].mxu1  ;;  %v1336_v11 = vld [vmem:[%s2675_s13 + $0x10] sm:$0xff] }
 0x433   :  { %v1138_v21 = vmul.f32 %v1121_v12, %v1095_v20  ;;  %v2136_v20 = vmov 0.0|0.0  }
 0x434   :  { %v1167_v22 = vadd.f32 %v1154_v13, %v1139_v19  ;;  %v1337_v13 = vld [vmem:[%s2675_s13 + $0x18] sm:$0xff] }
 0x435   :  { %v1166_v23 = vadd.f32 %v1149_v14, %v1138_v21  ;;  %v1874_v24 = vpop.f32.mrb[6].mxu1  ;;  %v2138_v21 = vmov 0.0  }
 0x436   :  { %v1175_v25 = vmin.f32 %v1167_v22, 0.0  ;;  %v1141_v28 = vmul.f32 %v1874_v24, %v1136_v16  ;;  %v1105_v26 = vpop.f32.mrb[7].mxu1  ;;  %vm1171_vm9 = vcmp.gt.f32.partialorder %v1167_v22, 0.0 }
 0x437   :  { %v1174_v29 = vmin.f32 %v1166_v23, 0.0  ;;  %v1140_v30 = vmul.f32 %v1131_v18, %v1105_v26  ;;  %vm1170_vm8 = vcmp.gt.f32.partialorder %v1166_v23, 0.0 }
 0x438   :  { %v1180_v15 = vmul.f32 1.442695, %v1175_v25  ;;  %v1169_v32 = vadd.f32 %v1164_v27, %v1141_v28  ;;  %v1443_v27 = vld [vmem:[%s2677_s15] sm:$0x3] }
 0x439   :  { %v1178_v33 = vmul.f32 1.442695, %v1174_v29  ;;  %v1168_v4 = vadd.f32 %v1159_v31, %v1140_v30  ;;  %v1614_v29 = vld [vmem:[%s2678_s16] ss:$0 sm:$0xff] }
 0x43a   :  { %2096 = vpow2.f32 %v1180_v15  ;;  %v1177_v34 = vmin.f32 %v1169_v32, 0.0  ;;  %vm1173_vm11 = vcmp.gt.f32.partialorder %v1169_v32, 0.0 }
 0x43b   :  { %2098 = vpow2.f32 %v1178_v33  ;;  %v1176_v35 = vmin.f32 %v1168_v4, 0.0  ;;  %vm1172_vm10 = vcmp.gt.f32.partialorder %v1168_v4, 0.0 }
 0x43c   :  { %v1184_v36 = vmul.f32 1.442695, %v1177_v34 }
 0x43d   :  { %v1182_v37 = vmul.f32 1.442695, %v1176_v35 }
 0x43e   :  { %2100 = vpow2.f32 %v1184_v36 }
 0x43f   :  { %2102 = vpow2.f32 %v1182_v37 }
 0x444   :  { %v2097_v38 = vpop.eup %2096 }
 0x445   :  { %v2099_v39 = vpop.eup %2098  ;;  %v1603_v40 = vadd.f32 -1.0, %v2097_v38 }
 0x446   :  { %v1602_v41 = vadd.f32 -1.0, %v2099_v39 }
 0x447   :  { %v1191_v45 = vsel %vm1171_vm9, %v1167_v22, %v1603_v40 }
 0x448   :  { %v2101_v42 = vpop.eup %2100  ;;  %v1190_v43 = vsel %vm1170_vm8, %v1166_v23, %v1602_v41 }
 0x449   :  { %v2103_v44 = vpop.eup %2102  ;;  %1885 = vmatprep.mubr.msk.f32.mxu0 %vm1199_vm7, %v1190_v43  ;;  %v1605_v46 = vadd.f32 -1.0, %v2101_v42 }
 0x44a   :  { %1886 = vmatmul.mubr.msk.f32.vlgmr.msra.gmra.mrb[12].mxu0 %vm1199_vm7, %v1191_v45  ;;  %v1604_v47 = vadd.f32 -1.0, %v2103_v44 }
 0x44b   :  { %v1193_v49 = vsel %vm1173_vm11, %v1169_v32, %v1605_v46  ;;  %2037 = vmatpush3.bf16.msra.mxu0 %v2034_v52 }
 0x44c   :  { %v1192_v48 = vsel %vm1172_vm10, %v1168_v4, %v1604_v47  ;;  %1895 = vmatprep.subr.mxu0 %v1344_v53 }
 0x44d   :  { %1888 = vmatprep.mubr.msk.f32.mxu0 %vm1199_vm7, %v1192_v48 }
 0x44e   :  { %1889 = vmatmul.mubr.msk.f32.gmra.mrb[14].mxu0 %vm1199_vm7, %v1193_v49 }
 0x44f   :  { %1896 = vmatpush3.msra.mxu0 %v1344_v53 }
 0x450   :  { %2038 = vmatprep.subr.bf16.mxu0 %v2136_v20 }
 0x51d   :  { %v1887_v54 = vpop.f32.mrb[12].mxu0 }
 0x51e   :  { %1303 = vrot.lane.b32.xlu1 %v1887_v54, %s2134_s20  ;;  %v1278_v55 = vpop.f32.mrb[13].mxu0 }
 0x51f   :  { %1301 = vrot.lane.b32.xlu0 %v1278_v55, %s2134_s20 }
 0x521   :  { %v1890_v56 = vpop.f32.mrb[14].mxu0 }
 0x522   :  { %1315 = vrot.lane.b32.xlu1 %v1887_v54, %s2135_s3  ;;  %v1288_v57 = vpop.f32.mrb[15].mxu0 }
 0x523   :  { %1313 = vrot.lane.b32.xlu0 %v1278_v55, %s2135_s3 }
 0x526   :  { %1307 = vrot.lane.b32.xlu1 %v1890_v56, %s2134_s20 }
 0x527   :  { %1305 = vrot.lane.b32.xlu0 %v1288_v57, %s2134_s20 }
 0x52a   :  { %1319 = vrot.lane.b32.xlu1 %v1890_v56, %s2135_s3 }
 0x52b   :  { %1317 = vrot.lane.b32.xlu0 %v1288_v57, %s2135_s3 }
 0x590   :  { %v1304_v58 = vpop.permute.xlu1 %1303 }
 0x591   :  { %v1302_v59 = vpop.permute.xlu0 %1301  ;;  %v1327_v60 = vsel %vm1325_vm12, %v1887_v54, %v1304_v58 }
 0x592   :  { %v1326_v63 = vsel %vm1325_vm12, %v1278_v55, %v1302_v59 }
 0x594   :  { %v1316_v61 = vpop.permute.xlu1 %1315 }
 0x595   :  { %v1331_v1 = vsel %vm63_vm0, %v1327_v60, %v1316_v61  ;;  %v1314_v2 = vpop.permute.xlu0 %1313 }
 0x596   :  { %v1330_v3 = vsel %vm63_vm0, %v1326_v63, %v1314_v2  ;;  %v1339_v6 = vmul.f32 %v1335_v0, %v1331_v1 }
 0x597   :  { %v1338_v5 = vmul.f32 %v1334_v62, %v1330_v3 }
 0x598   :  { %v1308_v7 = vpop.permute.xlu1 %1307 }
 0x599   :  { %1897 = vmatprep.mubr.msk.f32.mxu0 %vm1345_vm13, %v1338_v5  ;;  %v1306_v8 = vpop.permute.xlu0 %1305  ;;  %v1329_v9 = vsel %vm1325_vm12, %v1890_v56, %v1308_v7 }
 0x59a   :  { %1898 = vmatmul.mubr.msk.f32.vlgmr.msra.gmra.mrb[16].mxu0 %vm1345_vm13, %v1339_v6  ;;  %v1328_v12 = vsel %vm1325_vm12, %v1288_v57, %v1306_v8 }
 0x59c   :  { %v1320_v10 = vpop.permute.xlu1 %1319 }
 0x59d   :  { %v1333_v14 = vsel %vm63_vm0, %v1329_v9, %v1320_v10  ;;  %v1318_v16 = vpop.permute.xlu0 %1317 }
 0x59e   :  { %v1332_v17 = vsel %vm63_vm0, %v1328_v12, %v1318_v16  ;;  %v1341_v19 = vmul.f32 %v1337_v13, %v1333_v14 }
 0x59f   :  { %v1340_v18 = vmul.f32 %v1336_v11, %v1332_v17 }
 0x5a1   :  { %1900 = vmatprep.mubr.msk.f32.mxu0 %vm1345_vm13, %v1340_v18 }
 0x5a2   :  { %1901 = vmatmul.mubr.msk.f32.gmra.mrb[18].mxu0 %vm1345_vm13, %v1341_v19 }
 0x5a3   :  { %1911 = vmatprep.mubr.msk.f32.mxu0 %vm2137_vm14, %v2138_v21 }
 0x66d   :  { %v1899_v22 = vpop.f32.mrb[16].mxu0 }
 0x66e   :  { %v1424_v23 = vpop.f32.mrb[17].mxu0 }
 0x66f   :  { %v2039_v24 = vpack.c.bf16 %v1899_v22, %v1424_v23 }
 0x671   :  { %2040 = vmatpush3.bf16.msra.mxu0 %v2039_v24 }
 0x672   :  { %2041 = vmatprep.subr.bf16.mxu0 %v2136_v20 }
 0x675   :  { %v1902_v25 = vpop.f32.mrb[18].mxu0 }
 0x676   :  { %v1434_v28 = vpop.f32.mrb[19].mxu0 }
 0x677   :  { %v2042_v26 = vpack.c.bf16 %v1902_v25, %v1434_v28 }
 0x679   :  { %2043 = vmatpush3.bf16.msra.mxu0 %v2042_v26 }
 0x67c   :  { %1912 = vmatmul.mubr.msk.f32.vlgmr.msra.gmra.mrb[20].mxu0 %vm1016_vm6, %v1443_v27 }
 0x74f   :  { %v1520_v30 = vpop.f32.mrb[20].mxu0 }
 0x750   :  { %v1521_v31 = vadd.f32 %v1614_v29, %v1520_v30  ;;  %v1913_v15 = vpop.f32.mrb[21].mxu0 }
 0x752   :  { %1525 = vst.msk [vmem:[#allocation2] sm:$0x3] %vm1524_vm15, %v1521_v31 }
 0x753   :  { %2115 = shalt.err (!%p2112_p4)
}
 0x754   :  { %s2116_s27 = scalar_lea.hbm %s2679_s17, 32 }
 0x755   :  { %p2117_p5 = scmp.ne.s32.totalorder %s2679_s17, %s2116_s27  ;;  %p2120_p6 = scmp.lt.u32.totalorder %s2116_s27, %s2679_s17 }
 0x757   :  { %p2122_p7 = pnand %p2120_p6, %p2117_p5 }
 0x759   :  { %2125 = shalt.err (!%p2122_p7)
}
 0x75a   :  { %1535 = dma.vmem_to_hbm [thread:$0]  %s1533_s25, 32, %s2679_s17, [#allocation3]  }
 0x75b   :  { %2126 = dma.done.wait [#allocation3], 32  }
 0x75c   :  { %2127 = vsyncadd [#allocation3], 4294967264 }
 0x75d   :  { %1539 = vsyncpa [#allocation3], 1 }

</bundles_post_ra>
